<compile_context>
chip_gen: v7x
topology: tpu7x:2x2x1
jax: 0.10.0
libtpu: 0.0.40
codegen_flags: <defaults>
</compile_context>

<pallas_src>
import functools

import jax
import jax.numpy as jnp
from jax.experimental import pallas as pl
from jax.experimental.pallas import tpu as pltpu

_LANES = 128


def _round_up(x: int, m: int) -> int:
    return ((x + m - 1) // m) * m


def _cdiv(a: int, b: int) -> int:
    return -(-a // b)


def _harmonic_kernel(pos_ref, r0_ref, out_ref, acc_ref, *,
                     force_constant: float, ta: int, nk: int,
                     valid_lanes: int, mask_tail: bool, r0_resident: bool):
    # pos_ref: (TS, TA)      positions block (input dtype)
    # r0_ref : (1, L_pad) if resident else (1, TA)
    # out_ref: (TS, 128)     f32 lane-dense per-(row-block, col-group) partials
    # acc_ref: (TS, 128)     f32 VMEM accumulator, resident across k
    p = pl.program_id(1)
    k = pl.program_id(2)

    @pl.when(k == 0)
    def _init():
        acc_ref[...] = jnp.zeros_like(acc_ref)

    ts = acc_ref.shape[0]
    col_block = p * nk + k          # global column-block index
    lane0 = col_block * ta          # global lane offset of this block

    if mask_tail:
        lanes_iota = jax.lax.broadcasted_iota(jnp.int32, (ts, _LANES), 1)

    num_chunks = ta // _LANES

    def _mo(x):
        return x if isinstance(x, int) else pl.multiple_of(x, _LANES)

    def chunk_body(g, part):
        off = g * _LANES
        pos_c = pos_ref[:, pl.ds(_mo(off), _LANES)].astype(jnp.float32)
        r0_off = lane0 + off if r0_resident else off
        r0_c = r0_ref[:, pl.ds(_mo(r0_off), _LANES)].astype(jnp.float32)
        d = pos_c - r0_c
        sq = d * d
        if mask_tail:
            gidx = lane0 + off + lanes_iota
            sq = jnp.where(gidx < valid_lanes, sq, 0.0)
        return part + sq

    part0 = jnp.zeros((ts, _LANES), jnp.float32)
    if num_chunks <= 8:
        part = part0
        for g in range(num_chunks):        # fully unrolled, static offsets
            part = chunk_body(g, part)
    else:
        part = jax.lax.fori_loop(0, num_chunks, chunk_body, part0, unroll=8)

    acc_ref[...] += part

    @pl.when(k == pl.num_programs(2) - 1)
    def _finalize():
        # NOTE: force_constant * sum(d^2) == sum(force_constant * d^2);
        # applying the scale once here is intentional.
        out_ref[...] = force_constant * acc_ref[...]


def harmonic_energy(
    positions: jax.Array,
    r0: jax.Array,
    force_constant: float,
    *,
    ts_target: int = 64,      # systems tile target (multiple of 8 / 16)
    ta_target: int = 32768,   # flattened-atom tile target (f32 lanes)
) -> jax.Array:
    """positions: (n_systems, n_atoms, 3); r0: (n_atoms, 3) -> (n_systems, 1)."""
    assert positions.ndim == 3 and positions.shape[1:] == r0.shape
    n_systems, n_atoms, _ = positions.shape
    in_dtype = positions.dtype
    itemsize = jnp.dtype(in_dtype).itemsize
    L = n_atoms * 3

    # --- systems (row) tile: multiple of the native sublane tile; for small
    # batches pick ts so the parallel row axis gets >= 2 blocks when possible.
    sub = 8 if itemsize >= 4 else 16          # (8,128) f32 / (16,128) bf16 tiles
    ts_target = _round_up(max(ts_target, sub), sub)
    if n_systems <= 2 * ts_target:
        ts = _round_up(max(1, _cdiv(n_systems, 2)), sub)
    else:
        ts = ts_target
    ts = min(ts, _round_up(n_systems, sub))
    row_blocks = _cdiv(n_systems, ts)

    # --- lane (flattened-atom) tile: keep per-step DMA ~4-8 MiB, scale up for
    # narrow dtypes / small ts, and choose the block count so padding waste is
    # < 128 lanes per block (no L_pad ~2x blow-up).
    dtype_scale = max(1, 4 // itemsize)
    ta_t = ta_target * dtype_scale * max(1, ts_target // ts)
    ta_cap = max(_LANES, ((8 << 20) // (ts * itemsize)) // _LANES * _LANES)
    ta_t = max(_LANES, min(ta_t, ta_cap))

    nc0 = max(1, _cdiv(L, ta_t))
    # If only one row block, split columns into 2 parallel groups (v7x megacore).
    p_groups = 2 if (row_blocks == 1 and nc0 >= 2) else 1
    nc = p_groups * _cdiv(nc0, p_groups)
    ta = _round_up(_cdiv(L, nc), _LANES)
    if nc > 1 and (nc - 1) * ta >= L:
        # would create an entirely-out-of-bounds column block; fall back
        p_groups = 1
        nc = _cdiv(L, ta)
    nk = nc // p_groups
    L_pad = nc * ta
    mask_tail = (L_pad != L)

    # --- inputs: positions are only reshaped (free); never padded/copied.
    pos2d = positions.reshape(n_systems, L)
    r0_itemsize = jnp.dtype(r0.dtype).itemsize
    r0_resident = (L_pad * r0_itemsize) <= (4 << 20)
    r0_2d = jnp.pad(r0.reshape(1, L), ((0, 0), (0, L_pad - L)))  # 1 row: cheap

    grid = (row_blocks, p_groups, nk)
    s_out = row_blocks * ts

    if r0_resident:
        # Constant block index -> fetched once, stays VMEM-resident.
        r0_spec = pl.BlockSpec((1, L_pad), lambda i, p, k: (0, 0))
    else:
        r0_spec = pl.BlockSpec((1, ta), lambda i, p, k: (0, p * nk + k))

    kernel = functools.partial(
        _harmonic_kernel, force_constant=float(force_constant), ta=ta, nk=nk,
        valid_lanes=L, mask_tail=mask_tail, r0_resident=r0_resident)

    r0_buf = (L_pad if r0_resident else ta) * r0_itemsize
    vmem_need = 2 * ts * ta * itemsize + 2 * r0_buf + 3 * ts * _LANES * 4
    vmem_limit = int(min(max(2 * vmem_need + (4 << 20), 16 << 20), 48 << 20))

    cost = pl.CostEstimate(
        flops=3 * n_systems * L,
        transcendentals=0,
        bytes_accessed=(n_systems * L * itemsize
                        + (1 if r0_resident else row_blocks * p_groups) * L_pad * r0_itemsize
                        + s_out * p_groups * _LANES * 4),
    )

    out = pl.pallas_call(
        kernel,
        out_shape=jax.ShapeDtypeStruct((s_out, p_groups * _LANES), jnp.float32),
        grid_spec=pltpu.PrefetchScalarGridSpec(
            num_scalar_prefetch=0,
            grid=grid,
            in_specs=[
                pl.BlockSpec((ts, ta), lambda i, p, k: (i, p * nk + k)),
                r0_spec,
            ],
            out_specs=pl.BlockSpec((ts, _LANES), lambda i, p, k: (i, p)),
            scratch_shapes=[pltpu.VMEM((ts, _LANES), jnp.float32)],
        ),
        compiler_params=pltpu.CompilerParams(
            dimension_semantics=("parallel", "parallel", "arbitrary"),
            vmem_limit_bytes=vmem_limit,
        ),
        cost_estimate=cost,
    )(pos2d, r0_2d)

    # Final lane fold, row slice and dtype cast: cheap wrapper-side plumbing.
    energy = jnp.sum(out[:n_systems], axis=-1, keepdims=True)
    return energy.astype(in_dtype)


if __name__ == "__main__":
    key = jax.random.PRNGKey(0)
    k_pos, k_r0 = jax.random.split(key)

    force_constant = 3.14159

    def reference(pos, r0_):
        return jnp.sum(force_constant * (pos - r0_[None]) ** 2,
                       axis=(1, 2)).reshape(-1, 1)

    # Case 1: shapes implied by the original script (2 systems, 8 atoms).
    n_systems, n_atoms = 2, 8
    r0 = jax.random.normal(k_r0, (n_atoms, 3), dtype=jnp.float32)
    positions = r0[None] + 0.1 * jax.random.normal(
        k_pos, (n_systems, n_atoms, 3), dtype=jnp.float32)
    energy = jax.block_until_ready(harmonic_energy(positions, r0, force_constant))
    ref = reference(positions, r0)
    assert energy.shape == (n_systems, 1)
    assert energy.dtype == jnp.float32
    assert jnp.allclose(energy, ref, rtol=1e-5, atol=1e-6)

    # Case 2: exercises the fori_loop chunk path, ragged-lane masking and
    # multiple (partially out-of-bounds) system row blocks.
    n_systems, n_atoms = 20, 700
    r0b = jax.random.normal(k_r0, (n_atoms, 3), dtype=jnp.float32)
    posb = r0b[None] + 0.05 * jax.random.normal(
        k_pos, (n_systems, n_atoms, 3), dtype=jnp.float32)
    eb = jax.block_until_ready(harmonic_energy(posb, r0b, force_constant))
    assert jnp.allclose(eb, reference(posb, r0b), rtol=1e-5, atol=1e-4)

    # Case 3: small tile targets to exercise the multi-k reduction and the
    # parallel column-group split used when there is a single row block.
    n_systems, n_atoms = 2, 512
    r0c = jax.random.normal(k_r0, (n_atoms, 3), dtype=jnp.float32)
    posc = r0c[None] + 0.05 * jax.random.normal(
        k_pos, (n_systems, n_atoms, 3), dtype=jnp.float32)
    ec = jax.block_until_ready(
        harmonic_energy(posc, r0c, force_constant, ts_target=8, ta_target=256))
    assert jnp.allclose(ec, reference(posc, r0c), rtol=1e-5, atol=1e-4)

    print("KERNEL_OK")
</pallas_src>

<mosaic_0001>
module attributes {stable_mosaic.version = 11 : i64} {
  func.func @_harmonic_kernel(%arg0: i32, %arg1: i32, %arg2: i32, %arg3: memref<8x128xf32, #tpu.memory_space<vmem>>, %arg4: memref<1x128xf32, #tpu.memory_space<vmem>>, %arg5: memref<8x128xf32, #tpu.memory_space<vmem>>, %arg6: memref<8x128xf32, #tpu.memory_space<vmem>>) attributes {dimension_semantics = [#tpu.dimension_semantics<parallel>, #tpu.dimension_semantics<parallel>, #tpu.dimension_semantics<arbitrary>], iteration_bounds = array<i64: 1, 1, 1>, scalar_prefetch = 0 : i64, scratch_operands = 1 : i64, tpu.core_type = #tpu.core_type<tc>, window_params = [{transform_indices = @transform_0, window_bounds = array<i64: 8, 128>}, {pipeline_mode = #tpu.pipeline_mode<synchronous>, transform_indices = @transform_1, window_bounds = array<i64: 1, 128>}, {transform_indices = @transform_2, window_bounds = array<i64: 8, 128>}]} {
    %c0_i32 = arith.constant 0 : i32
    %0 = arith.cmpi eq, %arg2, %c0_i32 : i32
    %1 = arith.extui %0 : i1 to i32
    %c0_i32_0 = arith.constant 0 : i32
    %2 = arith.cmpi ne, %1, %c0_i32_0 : i32
    scf.if %2 {
      %cst_12 = arith.constant 0.000000e+00 : f32
      %30 = vector.broadcast %cst_12 : f32 to vector<8x128xf32>
      %c0_13 = arith.constant 0 : index
      %c0_14 = arith.constant 0 : index
      %31 = vector.load %arg6[%c0_13, %c0_14] : memref<8x128xf32, #tpu.memory_space<vmem>>, vector<8x128xf32>
      tpu.vector_store %arg6[%c0_13, %c0_14], %30 {strides = array<i32>} : memref<8x128xf32, #tpu.memory_space<vmem>>, vector<8x128xf32>,
    } else {
    }
    %c1_i32 = arith.constant 1 : i32
    %3 = arith.muli %arg1, %c1_i32 : i32
    %4 = arith.addi %3, %arg2 : i32
    %c128_i32 = arith.constant 128 : i32
    %5 = arith.muli %4, %c128_i32 : i32
    %6 = tpu.iota {dimensions = array<i32: 1>} : vector<8x128xi32>
    %cst = arith.constant 0.000000e+00 : f32
    %7 = vector.broadcast %cst : f32 to vector<8x128xf32>
    %c0 = arith.constant 0 : index
    %c0_1 = arith.constant 0 : index
    %8 = vector.load %arg3[%c0, %c0_1] : memref<8x128xf32, #tpu.memory_space<vmem>>, vector<8x128xf32>
    %c0_i32_2 = arith.constant 0 : i32
    %9 = arith.addi %5, %c0_i32_2 : i32
    %10 = tpu.assume_multiple %9, 128 : i32
    %c0_3 = arith.constant 0 : index
    %11 = arith.index_cast %10 : i32 to index
    %12 = vector.load %arg4[%c0_3, %11] : memref<1x128xf32, #tpu.memory_space<vmem>>, vector<1x128xf32>
    %13 = vector.broadcast %12 : vector<1x128xf32> to vector<8x128xf32>
    %14 = arith.subf %8, %13 : vector<8x128xf32>
    %15 = arith.mulf %14, %14 : vector<8x128xf32>
    %c0_i32_4 = arith.constant 0 : i32
    %16 = arith.addi %5, %c0_i32_4 : i32
    %17 = vector.broadcast %16 : i32 to vector<8x128xi32>
    %18 = arith.addi %17, %6 : vector<8x128xi32>
    %c24_i32 = arith.constant 24 : i32
    %19 = vector.broadcast %c24_i32 : i32 to vector<8x128xi32>
    %20 = arith.cmpi slt, %18, %19 : vector<8x128xi32>
    %cst_5 = arith.constant 0.000000e+00 : f32
    %21 = vector.broadcast %cst_5 : f32 to vector<8x128xf32>
    %22 = arith.select %20, %15, %21 : vector<8x128xi1>, vector<8x128xf32>
    %23 = arith.addf %7, %22 : vector<8x128xf32>
    %c0_6 = arith.constant 0 : index
    %c0_7 = arith.constant 0 : index
    %24 = vector.load %arg6[%c0_6, %c0_7] : memref<8x128xf32, #tpu.memory_space<vmem>>, vector<8x128xf32>
    %25 = arith.addf %24, %23 : vector<8x128xf32>
    %c0_8 = arith.constant 0 : index
    %c0_9 = arith.constant 0 : index
    %26 = vector.load %arg6[%c0_8, %c0_9] : memref<8x128xf32, #tpu.memory_space<vmem>>, vector<8x128xf32>
    tpu.vector_store %arg6[%c0_8, %c0_9], %25 {strides = array<i32>} : memref<8x128xf32, #tpu.memory_space<vmem>>, vector<8x128xf32>,
    %c0_i32_10 = arith.constant 0 : i32
    %27 = arith.cmpi eq, %arg2, %c0_i32_10 : i32
    %28 = arith.extui %27 : i1 to i32
    %c0_i32_11 = arith.constant 0 : i32
    %29 = arith.cmpi ne, %28, %c0_i32_11 : i32
    scf.if %29 {
      %c0_12 = arith.constant 0 : index
      %c0_13 = arith.constant 0 : index
      %30 = vector.load %arg6[%c0_12, %c0_13] : memref<8x128xf32, #tpu.memory_space<vmem>>, vector<8x128xf32>
      %cst_14 = arith.constant 3.141590e+00 : f32
      %31 = vector.broadcast %cst_14 : f32 to vector<8x128xf32>
      %32 = arith.mulf %31, %30 : vector<8x128xf32>
      %c0_15 = arith.constant 0 : index
      %c0_16 = arith.constant 0 : index
      %33 = vector.load %arg5[%c0_15, %c0_16] : memref<8x128xf32, #tpu.memory_space<vmem>>, vector<8x128xf32>
      tpu.vector_store %arg5[%c0_15, %c0_16], %32 {strides = array<i32>} : memref<8x128xf32, #tpu.memory_space<vmem>>, vector<8x128xf32>,
    } else {
    }
    return
  }
  func.func @transform_0(%arg0: i32, %arg1: i32, %arg2: i32) -> (i32, i32) {
    %c1_i32 = arith.constant 1 : i32
    %0 = arith.muli %arg1, %c1_i32 : i32
    %1 = arith.addi %0, %arg2 : i32
    %c0_i32 = arith.constant 0 : i32
    return %arg0, %1 : i32, i32
  }
  func.func @transform_1(%arg0: i32, %arg1: i32, %arg2: i32) -> (i32, i32) {
    %c0_i32 = arith.constant 0 : i32
    %c0_i32_0 = arith.constant 0 : i32
    %c0_i32_1 = arith.constant 0 : i32
    return %c0_i32, %c0_i32_0 : i32, i32
  }
  func.func @transform_2(%arg0: i32, %arg1: i32, %arg2: i32) -> (i32, i32) {
    %c0_i32 = arith.constant 0 : i32
    return %arg0, %arg1 : i32, i32
  }
}

</mosaic_0001>

<bundles_post_ra>
// kernel: tpu_custom_call.1
= control target key start
LH: loop header
LB: loop body
LE: loop exit
PB: predicated region body
PF: predicated region fallthrough
CT: control target
= control target key end

     0   :  { %7 = vsyncpa [#allocation4], 0  ;;  %s181_s0 = inlined_call_operand.hbm [shape: f32[2,24], index: 0, kind: input, shape index: {}]   ;;  %s182_s1 = inlined_call_operand.vmem [shape: f32[1,128], index: 1, kind: input, shape index: {}]   ;;  %s183_s2 = inlined_call_operand.hbm [shape: f32[8,128], index: 2, kind: output, shape index: {}]  }
   0x1   :  { %8 = vsyncpa [#allocation5], 0 }
   0x2   :  { %14 = vsyncadd [#allocation4], 96  ;;  %s135_s9 = smov [#allocation3]   ;;  %s87_s13 = scalar_lea.hbm %s181_s0, 32 }
   0x3   :  { %s17_s10 = sshll.u32 %s135_s9, 4  ;;  %p88_p0 = scmp.ne.s32.totalorder %s181_s0, %s87_s13  ;;  %s18_s10 = int_to_ptr.vmem [resolvable:$true] %s17_s10 }
   0x4   :  { %p91_p1 = scmp.lt.u32.totalorder %s87_s13, %s181_s0 }
   0x6   :  { %p93_p2 = pnand %p91_p1, %p88_p0 }
   0x8   :  { %96 = shalt.err (!%p93_p2)
}
   0x9   :  { %s97_s18 = scalar_lea.vmem %s18_s10, 32  ;;  %s101_s19 = scalar_lea.vmem %s18_s10, 128 }
   0xa   :  { %p98_p3 = scmp.ne.s32.totalorder %s18_s10, %s97_s18  ;;  %p102_p4 = scmp.lt.s32.totalorder %s18_s10, %s18_s10 }
   0xb   :  { %p103_p5 = scmp.lt.s32.totalorder %s101_s19, %s97_s18 }
   0xd   :  { %p104_p6 = por %p103_p5, %p102_p4 }
   0xf   :  { %p105_p7 = pnand %p104_p6, %p98_p3 }
  0x11   :  { %108 = shalt.err (!%p105_p7)
}
  0x12   :  { %s136_s20 = smov 32   ;;  %s137_s21 = smov 2  }
  0x13   :  { %23 = dma.hbm_to_vmem [thread:$0]  %s181_s0, 32, %s18_s10, [#allocation4], %s136_s20, %s136_s20, %s137_s21  }
  0x14   :  { %131 = dma.done.wait [#allocation4], 128  }
  0x15   :  { %132 = vsyncadd [#allocation4], 4294967168  ;;  %v37_v0 = vlaneseq  ;;  %v39_v2 = vld [vmem:[#allocation3] sm:$0xff]  ;;  %s138_s26 = smov [#allocation6]  }
  0x16   :  { %v82_v3 = vld [vmem:[%s182_s1] ss:$0 sm:$0xff]  ;;  %s72_s27 = sshll.u32 %s138_s26, 4  ;;  %s73_s27 = int_to_ptr.vmem [resolvable:$true] %s72_s27 }
  0x17   :  { %v38_v1 = vand.u32 127, %v37_v0  ;;  %v50_v4 = vsub.f32 %v39_v2, %v82_v3  ;;  %s109_s28 = scalar_lea.vmem %s73_s27, 128  ;;  %p114_p9 = scmp.lt.s32.totalorder %s73_s27, %s73_s27 }
  0x18   :  { %p110_p8 = scmp.ne.s32.totalorder %s73_s27, %s109_s28  ;;  %p115_p10 = scmp.lt.s32.totalorder %s109_s28, %s109_s28 }
  0x19   :  { %vm54_vm0 = vcmp.lt.s32.totalorder %v38_v1, 24  ;;  %v51_v5 = vmul.f32 %v50_v4, %v50_v4 }
  0x1a   :  { %p116_p11 = por %p115_p10, %p114_p9 }
  0x1b   :  { %v55_v6 = vsel %vm54_vm0, %v51_v5, 0.0 }
  0x1c   :  { %v64_v7 = vmul.f32 3.14159, %v55_v6  ;;  %p117_p12 = pnand %p116_p11, %p110_p8 }
  0x1e   :  { %65 = vst [vmem:[#allocation6] sm:$0xff] %v64_v7 }
  0x1f   :  { %120 = shalt.err (!%p117_p12)
}
  0x20   :  { %s121_s1 = scalar_lea.hbm %s183_s2, 128 }
  0x21   :  { %p122_p13 = scmp.ne.s32.totalorder %s183_s2, %s121_s1  ;;  %p125_p0 = scmp.lt.u32.totalorder %s121_s1, %s183_s2 }
  0x23   :  { %p127_p1 = pnand %p125_p0, %p122_p13 }
  0x25   :  { %130 = shalt.err (!%p127_p1)
}
  0x26   :  { %75 = dma.vmem_to_hbm [thread:$0]  %s73_s27, 128, %s183_s2, [#allocation5]  }
  0x27   :  { %133 = dma.done.wait [#allocation5], 128  }
  0x28   :  { %134 = vsyncadd [#allocation5], 4294967168 }
  0x29   :  { %79 = vsyncpa [#allocation4], 1 }
  0x2a   :  { %80 = vsyncpa [#allocation5], 1 }

</bundles_post_ra>
